<compile_context>
chip_gen: v7x
topology: tpu7x:2x2x1
jax: 0.10.0
libtpu: 0.0.40
codegen_flags: <defaults>
</compile_context>

<pallas_src>
import functools

import jax
import jax.numpy as jnp
import numpy as np
from jax import lax
from jax.experimental import pallas as pl
from jax.experimental.pallas import tpu as pltpu


def _mha_flash_kernel(xq_ref, xkv_ref, wq_ref, bq_ref, wkv_ref, bkv_ref,
                      o_ref, q_scr, m_scr, l_scr, acc_scr, *, n_heads):
    # xq_ref : (1, TQ, D)   query-side activation tile (heads packed on D)
    # xkv_ref: (1, TK, D)   kv-side activation tile
    # wq_ref : (H, dh, dh)  per-head Q weight, (in, out) layout, scale folded
    # bq_ref : (H, 1, dh)   per-head Q bias, scale folded
    # wkv_ref: (H, dh, 2dh) per-head fused [K | V] weight, (in, out) layout
    # bkv_ref: (H, 1, 2dh)  per-head fused [K | V] bias
    # o_ref  : (1, TQ, D)
    ki = pl.program_id(2)
    d_head = wq_ref.shape[1]

    @pl.when(ki == 0)
    def _init():
        # Project Q for all heads once per (batch, q-tile); reused across KV steps.
        xq = xq_ref[0]                                               # (TQ, D)
        for h in range(n_heads):
            lo = h * d_head
            xh = xq[:, lo:lo + d_head]                               # (TQ, dh)
            q_scr[h] = (jnp.dot(xh, wq_ref[h],
                                preferred_element_type=jnp.float32)
                        + bq_ref[h])
        m_scr[...] = jnp.full(m_scr.shape, -jnp.inf, jnp.float32)
        l_scr[...] = jnp.zeros(l_scr.shape, jnp.float32)
        acc_scr[...] = jnp.zeros(acc_scr.shape, jnp.float32)

    # Online-softmax update for this KV tile.
    xkv = xkv_ref[0]                                                 # (TK, D)
    for h in range(n_heads):                                         # static unroll
        lo = h * d_head
        xh = xkv[:, lo:lo + d_head]                                  # (TK, dh)
        kv = (jnp.dot(xh, wkv_ref[h], preferred_element_type=jnp.float32)
              + bkv_ref[h])                                          # (TK, 2dh)
        kh = kv[:, :d_head]
        vh = kv[:, d_head:]

        # scores = q @ k^T with no explicit in-kernel transpose (contracting dims).
        s = lax.dot_general(q_scr[h], kh, (((1,), (1,)), ((), ())),
                            preferred_element_type=jnp.float32)      # (TQ, TK)

        m_prev = m_scr[h]                                            # (TQ, 1)
        m_new = jnp.maximum(m_prev, jnp.max(s, axis=-1, keepdims=True))
        alpha = jnp.exp(m_prev - m_new)
        p = jnp.exp(s - m_new)
        l_scr[h] = alpha * l_scr[h] + jnp.sum(p, axis=-1, keepdims=True)
        acc_scr[h] = alpha * acc_scr[h] + jnp.dot(
            p, vh, preferred_element_type=jnp.float32)
        m_scr[h] = m_new

    @pl.when(ki == pl.num_programs(2) - 1)
    def _finalize():
        outs = []
        for h in range(n_heads):
            l = l_scr[h]
            inv = pl.reciprocal(l, approx=True)      # EUP slot
            inv = inv * (2.0 - l * inv)              # one Newton step, rel err ~1e-7
            outs.append(acc_scr[h] * inv)
        # One lane-dense (TQ, D) store (heads packed along the last axis).
        o_ref[0] = jnp.concatenate(outs, axis=-1).astype(o_ref.dtype)


def _pick_tile(s, target):
    """Largest tile <= target that divides s and is a multiple of 8, else s."""
    if s <= target:
        return s
    for cand in range(target, 7, -1):
        if s % cand == 0 and cand % 8 == 0:
            return cand
    return s


def mha_pallas(x, wq, bq, wk, bk, wv, bv, n_heads, *, q_tile=256, kv_tile=512):
    """x: (B, S, D); w*: (n_heads, d_head, d_head) PyTorch (out, in); b*: (n_heads, d_head)."""
    B, S, D = x.shape
    assert D % n_heads == 0, "d must be divisible by n_heads"
    d_head = D // n_heads
    scale = 1.0 / float(np.sqrt(d_head))

    # --- host-side weight prep (tiny, done once) ----------------------------
    # nn.Linear stores (out, in); the kernel wants (in, out).  The 1/sqrt(dh)
    # attention scale is folded into the Q projection (weight AND bias).
    wq_io = jnp.transpose(wq, (0, 2, 1)) * scale                    # (H, dh, dh)
    bq_s = (bq * scale).reshape(n_heads, 1, d_head)                 # (H, 1, dh)
    wkv_io = jnp.concatenate([jnp.transpose(wk, (0, 2, 1)),
                              jnp.transpose(wv, (0, 2, 1))], axis=-1)  # (H, dh, 2dh)
    bkv = jnp.concatenate([bk, bv], axis=-1).reshape(n_heads, 1, 2 * d_head)

    TQ = _pick_tile(S, q_tile)
    TK = _pick_tile(S, kv_tile)
    grid = (B, S // TQ, S // TK)

    kernel = functools.partial(_mha_flash_kernel, n_heads=n_heads)
    const = lambda b, qi, ki: (0, 0, 0)

    return pl.pallas_call(
        kernel,
        out_shape=jax.ShapeDtypeStruct((B, S, D), x.dtype),
        grid_spec=pltpu.PrefetchScalarGridSpec(
            num_scalar_prefetch=0,
            grid=grid,
            in_specs=[
                pl.BlockSpec((1, TQ, D), lambda b, qi, ki: (b, qi, 0)),  # q-side x
                pl.BlockSpec((1, TK, D), lambda b, qi, ki: (b, ki, 0)),  # kv-side x
                pl.BlockSpec((n_heads, d_head, d_head), const),          # Wq (resident)
                pl.BlockSpec((n_heads, 1, d_head), const),               # bq (resident)
                pl.BlockSpec((n_heads, d_head, 2 * d_head), const),      # [Wk|Wv] (resident)
                pl.BlockSpec((n_heads, 1, 2 * d_head), const),           # [bk|bv] (resident)
            ],
            out_specs=pl.BlockSpec((1, TQ, D), lambda b, qi, ki: (b, qi, 0)),
            scratch_shapes=[
                pltpu.VMEM((n_heads, TQ, d_head), jnp.float32),  # scaled Q per head
                pltpu.VMEM((n_heads, TQ, 1), jnp.float32),       # running max
                pltpu.VMEM((n_heads, TQ, 1), jnp.float32),       # running denom
                pltpu.VMEM((n_heads, TQ, d_head), jnp.float32),  # output accumulator
            ],
        ),
        compiler_params=pltpu.CompilerParams(
            dimension_semantics=("parallel", "parallel", "arbitrary"),
            # vmem_limit_bytes would be raised here when scaling S/D on v5e
            # (16 MiB scoped default); not needed at these sizes.
        ),
    )(x, x, wq_io, bq_s, wkv_io, bkv)


def mha_reference(x, wq, bq, wk, bk, wv, bv, n_heads):
    """Pure-JAX reference mirroring the PyTorch loop semantics."""
    B, S, D = x.shape
    d_head = D // n_heads
    results = []
    for b in range(B):
        head_outs = []
        for h in range(n_heads):
            seq = x[b, :, h * d_head:(h + 1) * d_head]
            q = seq @ wq[h].T + bq[h]
            k = seq @ wk[h].T + bk[h]
            v = seq @ wv[h].T + bv[h]
            pre = (q @ k.T) / (d_head ** 0.5)
            attn = jax.nn.softmax(pre, axis=-1)
            head_outs.append(attn @ v)
        results.append(jnp.concatenate(head_outs, axis=-1))
    return jnp.stack(results, axis=0)


def _make_params(key, n_heads, d_head):
    kwq, kbq, kwk, kbk, kwv, kbv = jax.random.split(key, 6)
    s = 1.0 / np.sqrt(d_head)
    wq = jax.random.uniform(kwq, (n_heads, d_head, d_head), jnp.float32, -s, s)
    bq = jax.random.uniform(kbq, (n_heads, d_head), jnp.float32, -s, s)
    wk = jax.random.uniform(kwk, (n_heads, d_head, d_head), jnp.float32, -s, s)
    bk = jax.random.uniform(kbk, (n_heads, d_head), jnp.float32, -s, s)
    wv = jax.random.uniform(kwv, (n_heads, d_head, d_head), jnp.float32, -s, s)
    bv = jax.random.uniform(kbv, (n_heads, d_head), jnp.float32, -s, s)
    return wq, bq, wk, bk, wv, bv


if __name__ == "__main__":
    key = jax.random.PRNGKey(0)
    k1, k2, kp1, kp2 = jax.random.split(key, 4)

    # Primary check: module-sized small shapes (single tile per batch).
    B, S, D, n_heads = 2, 8, 32, 2
    d_head = D // n_heads
    x = jax.random.normal(k1, (B, S, D), dtype=jnp.float32)
    params = _make_params(kp1, n_heads, d_head)

    out = mha_pallas(x, *params, n_heads)
    out = jax.block_until_ready(out)
    ref = mha_reference(x, *params, n_heads)
    np.testing.assert_allclose(np.asarray(out), np.asarray(ref), rtol=1e-5, atol=1e-5)

    # Secondary check: force multi-tile grid (q tiling + online-softmax KV loop).
    B2, S2 = 2, 32
    x2 = jax.random.normal(k2, (B2, S2, D), dtype=jnp.float32)
    params2 = _make_params(kp2, n_heads, d_head)
    out2 = mha_pallas(x2, *params2, n_heads, q_tile=16, kv_tile=8)
    out2 = jax.block_until_ready(out2)
    ref2 = mha_reference(x2, *params2, n_heads)
    np.testing.assert_allclose(np.asarray(out2), np.asarray(ref2), rtol=1e-5, atol=1e-5)

    print("KERNEL_OK")
</pallas_src>

<mosaic_0001>
module attributes {stable_mosaic.version = 11 : i64} {
  func.func @_mha_flash_kernel(%arg0: i32, %arg1: i32, %arg2: i32, %arg3: memref<1x8x32xf32, #tpu.memory_space<vmem>>, %arg4: memref<1x8x32xf32, #tpu.memory_space<vmem>>, %arg5: memref<2x16x16xf32, #tpu.memory_space<vmem>>, %arg6: memref<2x1x16xf32, #tpu.memory_space<vmem>>, %arg7: memref<2x16x32xf32, #tpu.memory_space<vmem>>, %arg8: memref<2x1x32xf32, #tpu.memory_space<vmem>>, %arg9: memref<1x8x32xf32, #tpu.memory_space<vmem>>, %arg10: memref<2x8x16xf32, #tpu.memory_space<vmem>>, %arg11: memref<2x8x1xf32, #tpu.memory_space<vmem>>, %arg12: memref<2x8x1xf32, #tpu.memory_space<vmem>>, %arg13: memref<2x8x16xf32, #tpu.memory_space<vmem>>) attributes {dimension_semantics = [#tpu.dimension_semantics<parallel>, #tpu.dimension_semantics<parallel>, #tpu.dimension_semantics<arbitrary>], iteration_bounds = array<i64: 2, 1, 1>, scalar_prefetch = 0 : i64, scratch_operands = 4 : i64, tpu.core_type = #tpu.core_type<tc>, window_params = [{transform_indices = @transform_0, window_bounds = array<i64: 1, 8, 32>}, {transform_indices = @transform_1, window_bounds = array<i64: 1, 8, 32>}, {pipeline_mode = #tpu.pipeline_mode<synchronous>, transform_indices = @transform_2, window_bounds = array<i64: 2, 16, 16>}, {pipeline_mode = #tpu.pipeline_mode<synchronous>, transform_indices = @transform_3, window_bounds = array<i64: 2, 1, 16>}, {pipeline_mode = #tpu.pipeline_mode<synchronous>, transform_indices = @transform_4, window_bounds = array<i64: 2, 16, 32>}, {pipeline_mode = #tpu.pipeline_mode<synchronous>, transform_indices = @transform_5, window_bounds = array<i64: 2, 1, 32>}, {transform_indices = @transform_6, window_bounds = array<i64: 1, 8, 32>}]} {
    %c0_i32 = arith.constant 0 : i32
    %0 = arith.cmpi eq, %arg2, %c0_i32 : i32
    %1 = arith.extui %0 : i1 to i32
    %c0_i32_0 = arith.constant 0 : i32
    %2 = arith.cmpi ne, %1, %c0_i32_0 : i32
    scf.if %2 {
      %c0_67 = arith.constant 0 : index
      %c0_68 = arith.constant 0 : index
      %c0_69 = arith.constant 0 : index
      %96 = vector.load %arg3[%c0_67, %c0_68, %c0_69] : memref<1x8x32xf32, #tpu.memory_space<vmem>>, vector<1x8x32xf32>
      %97 = vector.shape_cast %96 : vector<1x8x32xf32> to vector<8x32xf32>
      %98 = vector.extract_strided_slice %97 {offsets = [0, 0], sizes = [8, 16], strides = [1, 1]} : vector<8x32xf32> to vector<8x16xf32>
      %c0_70 = arith.constant 0 : index
      %c0_71 = arith.constant 0 : index
      %c0_72 = arith.constant 0 : index
      %99 = vector.load %arg5[%c0_70, %c0_71, %c0_72] : memref<2x16x16xf32, #tpu.memory_space<vmem>>, vector<1x16x16xf32>
      %100 = vector.shape_cast %99 : vector<1x16x16xf32> to vector<16x16xf32>
      %cst_73 = arith.constant dense<0.000000e+00> : vector<8x16xf32>
      %101 = tpu.matmul %98, %100, %cst_73 {dimension_numbers = #tpu.dot_dimension_numbers<[1], [0], [0], [1], [0, 0, 1, 1], [], []>} : vector<8x16xf32>, vector<16x16xf32>, vector<8x16xf32> -> vector<8x16xf32>
      %c0_74 = arith.constant 0 : index
      %c0_75 = arith.constant 0 : index
      %c0_76 = arith.constant 0 : index
      %102 = vector.load %arg6[%c0_74, %c0_75, %c0_76] : memref<2x1x16xf32, #tpu.memory_space<vmem>>, vector<1x1x16xf32>
      %103 = vector.shape_cast %102 : vector<1x1x16xf32> to vector<1x16xf32>
      %104 = vector.broadcast %103 : vector<1x16xf32> to vector<8x16xf32>
      %105 = arith.addf %101, %104 : vector<8x16xf32>
      %c0_77 = arith.constant 0 : index
      %c0_78 = arith.constant 0 : index
      %c0_79 = arith.constant 0 : index
      %106 = vector.load %arg10[%c0_77, %c0_78, %c0_79] : memref<2x8x16xf32, #tpu.memory_space<vmem>>, vector<1x8x16xf32>
      %107 = vector.shape_cast %106 : vector<1x8x16xf32> to vector<8x16xf32>
      %108 = vector.shape_cast %105 : vector<8x16xf32> to vector<1x8x16xf32>
      tpu.vector_store %arg10[%c0_77, %c0_78, %c0_79], %108 {strides = array<i32>} : memref<2x8x16xf32, #tpu.memory_space<vmem>>, vector<1x8x16xf32>,
      %109 = vector.extract_strided_slice %97 {offsets = [0, 16], sizes = [8, 16], strides = [1, 1]} : vector<8x32xf32> to vector<8x16xf32>
      %c1_80 = arith.constant 1 : index
      %c0_81 = arith.constant 0 : index
      %c0_82 = arith.constant 0 : index
      %110 = vector.load %arg5[%c1_80, %c0_81, %c0_82] : memref<2x16x16xf32, #tpu.memory_space<vmem>>, vector<1x16x16xf32>
      %111 = vector.shape_cast %110 : vector<1x16x16xf32> to vector<16x16xf32>
      %cst_83 = arith.constant dense<0.000000e+00> : vector<8x16xf32>
      %112 = tpu.matmul %109, %111, %cst_83 {dimension_numbers = #tpu.dot_dimension_numbers<[1], [0], [0], [1], [0, 0, 1, 1], [], []>} : vector<8x16xf32>, vector<16x16xf32>, vector<8x16xf32> -> vector<8x16xf32>
      %c1_84 = arith.constant 1 : index
      %c0_85 = arith.constant 0 : index
      %c0_86 = arith.constant 0 : index
      %113 = vector.load %arg6[%c1_84, %c0_85, %c0_86] : memref<2x1x16xf32, #tpu.memory_space<vmem>>, vector<1x1x16xf32>
      %114 = vector.shape_cast %113 : vector<1x1x16xf32> to vector<1x16xf32>
      %115 = vector.broadcast %114 : vector<1x16xf32> to vector<8x16xf32>
      %116 = arith.addf %112, %115 : vector<8x16xf32>
      %c1_87 = arith.constant 1 : index
      %c0_88 = arith.constant 0 : index
      %c0_89 = arith.constant 0 : index
      %117 = vector.load %arg10[%c1_87, %c0_88, %c0_89] : memref<2x8x16xf32, #tpu.memory_space<vmem>>, vector<1x8x16xf32>
      %118 = vector.shape_cast %117 : vector<1x8x16xf32> to vector<8x16xf32>
      %119 = vector.shape_cast %116 : vector<8x16xf32> to vector<1x8x16xf32>
      tpu.vector_store %arg10[%c1_87, %c0_88, %c0_89], %119 {strides = array<i32>} : memref<2x8x16xf32, #tpu.memory_space<vmem>>, vector<1x8x16xf32>,
      %cst_90 = arith.constant 0xFF800000 : f32
      %120 = vector.broadcast %cst_90 : f32 to vector<2x8x1xf32>
      %c0_91 = arith.constant 0 : index
      %c0_92 = arith.constant 0 : index
      %c0_93 = arith.constant 0 : index
      %121 = vector.load %arg11[%c0_91, %c0_92, %c0_93] : memref<2x8x1xf32, #tpu.memory_space<vmem>>, vector<2x8x1xf32>
      tpu.vector_store %arg11[%c0_91, %c0_92, %c0_93], %120 {strides = array<i32>} : memref<2x8x1xf32, #tpu.memory_space<vmem>>, vector<2x8x1xf32>,
      %cst_94 = arith.constant 0.000000e+00 : f32
      %122 = vector.broadcast %cst_94 : f32 to vector<2x8x1xf32>
      %c0_95 = arith.constant 0 : index
      %c0_96 = arith.constant 0 : index
      %c0_97 = arith.constant 0 : index
      %123 = vector.load %arg12[%c0_95, %c0_96, %c0_97] : memref<2x8x1xf32, #tpu.memory_space<vmem>>, vector<2x8x1xf32>
      tpu.vector_store %arg12[%c0_95, %c0_96, %c0_97], %122 {strides = array<i32>} : memref<2x8x1xf32, #tpu.memory_space<vmem>>, vector<2x8x1xf32>,
      %cst_98 = arith.constant 0.000000e+00 : f32
      %124 = vector.broadcast %cst_98 : f32 to vector<2x8x16xf32>
      %c0_99 = arith.constant 0 : index
      %c0_100 = arith.constant 0 : index
      %c0_101 = arith.constant 0 : index
      %125 = vector.load %arg13[%c0_99, %c0_100, %c0_101] : memref<2x8x16xf32, #tpu.memory_space<vmem>>, vector<2x8x16xf32>
      tpu.vector_store %arg13[%c0_99, %c0_100, %c0_101], %124 {strides = array<i32>} : memref<2x8x16xf32, #tpu.memory_space<vmem>>, vector<2x8x16xf32>,
    } else {
    }
    %c0 = arith.constant 0 : index
    %c0_1 = arith.constant 0 : index
    %c0_2 = arith.constant 0 : index
    %3 = vector.load %arg4[%c0, %c0_1, %c0_2] : memref<1x8x32xf32, #tpu.memory_space<vmem>>, vector<1x8x32xf32>
    %4 = vector.shape_cast %3 : vector<1x8x32xf32> to vector<8x32xf32>
    %5 = vector.extract_strided_slice %4 {offsets = [0, 0], sizes = [8, 16], strides = [1, 1]} : vector<8x32xf32> to vector<8x16xf32>
    %c0_3 = arith.constant 0 : index
    %c0_4 = arith.constant 0 : index
    %c0_5 = arith.constant 0 : index
    %6 = vector.load %arg7[%c0_3, %c0_4, %c0_5] : memref<2x16x32xf32, #tpu.memory_space<vmem>>, vector<1x16x32xf32>
    %7 = vector.shape_cast %6 : vector<1x16x32xf32> to vector<16x32xf32>
    %cst = arith.constant dense<0.000000e+00> : vector<8x32xf32>
    %8 = tpu.matmul %5, %7, %cst {dimension_numbers = #tpu.dot_dimension_numbers<[1], [0], [0], [1], [0, 0, 1, 1], [], []>} : vector<8x16xf32>, vector<16x32xf32>, vector<8x32xf32> -> vector<8x32xf32>
    %c0_6 = arith.constant 0 : index
    %c0_7 = arith.constant 0 : index
    %c0_8 = arith.constant 0 : index
    %9 = vector.load %arg8[%c0_6, %c0_7, %c0_8] : memref<2x1x32xf32, #tpu.memory_space<vmem>>, vector<1x1x32xf32>
    %10 = vector.shape_cast %9 : vector<1x1x32xf32> to vector<1x32xf32>
    %11 = vector.broadcast %10 : vector<1x32xf32> to vector<8x32xf32>
    %12 = arith.addf %8, %11 : vector<8x32xf32>
    %13 = vector.extract_strided_slice %12 {offsets = [0, 0], sizes = [8, 16], strides = [1, 1]} : vector<8x32xf32> to vector<8x16xf32>
    %14 = vector.extract_strided_slice %12 {offsets = [0, 16], sizes = [8, 16], strides = [1, 1]} : vector<8x32xf32> to vector<8x16xf32>
    %c0_9 = arith.constant 0 : index
    %c0_10 = arith.constant 0 : index
    %c0_11 = arith.constant 0 : index
    %15 = vector.load %arg10[%c0_9, %c0_10, %c0_11] : memref<2x8x16xf32, #tpu.memory_space<vmem>>, vector<1x8x16xf32>
    %16 = vector.shape_cast %15 : vector<1x8x16xf32> to vector<8x16xf32>
    %cst_12 = arith.constant dense<0.000000e+00> : vector<8x8xf32>
    %17 = tpu.matmul %16, %13, %cst_12 {dimension_numbers = #tpu.dot_dimension_numbers<[1], [1], [0], [0], [0, 0, 1, 0], [], []>} : vector<8x16xf32>, vector<8x16xf32>, vector<8x8xf32> -> vector<8x8xf32>
    %c0_13 = arith.constant 0 : index
    %c0_14 = arith.constant 0 : index
    %c0_15 = arith.constant 0 : index
    %18 = vector.load %arg11[%c0_13, %c0_14, %c0_15] : memref<2x8x1xf32, #tpu.memory_space<vmem>>, vector<1x8x1xf32>
    %19 = vector.shape_cast %18 : vector<1x8x1xf32> to vector<8x1xf32>
    %cst_16 = arith.constant dense<0xFF800000> : vector<8xf32>
    %20 = vector.multi_reduction <maximumf>, %17, %cst_16 [1] : vector<8x8xf32> to vector<8xf32>
    %21 = vector.shape_cast %20 : vector<8xf32> to vector<8x1xf32>
    %22 = arith.maximumf %19, %21 : vector<8x1xf32>
    %23 = arith.subf %19, %22 : vector<8x1xf32>
    %24 = math.exp %23 : vector<8x1xf32>
    %25 = vector.broadcast %22 : vector<8x1xf32> to vector<8x8xf32>
    %26 = arith.subf %17, %25 : vector<8x8xf32>
    %27 = math.exp %26 : vector<8x8xf32>
    %c0_17 = arith.constant 0 : index
    %c0_18 = arith.constant 0 : index
    %c0_19 = arith.constant 0 : index
    %28 = vector.load %arg12[%c0_17, %c0_18, %c0_19] : memref<2x8x1xf32, #tpu.memory_space<vmem>>, vector<1x8x1xf32>
    %29 = vector.shape_cast %28 : vector<1x8x1xf32> to vector<8x1xf32>
    %30 = arith.mulf %24, %29 : vector<8x1xf32>
    %cst_20 = arith.constant dense<0.000000e+00> : vector<8xf32>
    %31 = vector.multi_reduction <add>, %27, %cst_20 [1] : vector<8x8xf32> to vector<8xf32>
    %32 = vector.shape_cast %31 : vector<8xf32> to vector<8x1xf32>
    %33 = arith.addf %30, %32 : vector<8x1xf32>
    %c0_21 = arith.constant 0 : index
    %c0_22 = arith.constant 0 : index
    %c0_23 = arith.constant 0 : index
    %34 = vector.load %arg12[%c0_21, %c0_22, %c0_23] : memref<2x8x1xf32, #tpu.memory_space<vmem>>, vector<1x8x1xf32>
    %35 = vector.shape_cast %34 : vector<1x8x1xf32> to vector<8x1xf32>
    %36 = vector.shape_cast %33 : vector<8x1xf32> to vector<1x8x1xf32>
    tpu.vector_store %arg12[%c0_21, %c0_22, %c0_23], %36 {strides = array<i32>} : memref<2x8x1xf32, #tpu.memory_space<vmem>>, vector<1x8x1xf32>,
    %c0_24 = arith.constant 0 : index
    %c0_25 = arith.constant 0 : index
    %c0_26 = arith.constant 0 : index
    %37 = vector.load %arg13[%c0_24, %c0_25, %c0_26] : memref<2x8x16xf32, #tpu.memory_space<vmem>>, vector<1x8x16xf32>
    %38 = vector.shape_cast %37 : vector<1x8x16xf32> to vector<8x16xf32>
    %39 = vector.broadcast %24 : vector<8x1xf32> to vector<8x16xf32>
    %40 = arith.mulf %39, %38 : vector<8x16xf32>
    %cst_27 = arith.constant dense<0.000000e+00> : vector<8x16xf32>
    %41 = tpu.matmul %27, %14, %cst_27 {dimension_numbers = #tpu.dot_dimension_numbers<[1], [0], [0], [1], [0, 0, 1, 1], [], []>} : vector<8x8xf32>, vector<8x16xf32>, vector<8x16xf32> -> vector<8x16xf32>
    %42 = arith.addf %40, %41 : vector<8x16xf32>
    %c0_28 = arith.constant 0 : index
    %c0_29 = arith.constant 0 : index
    %c0_30 = arith.constant 0 : index
    %43 = vector.load %arg13[%c0_28, %c0_29, %c0_30] : memref<2x8x16xf32, #tpu.memory_space<vmem>>, vector<1x8x16xf32>
    %44 = vector.shape_cast %43 : vector<1x8x16xf32> to vector<8x16xf32>
    %45 = vector.shape_cast %42 : vector<8x16xf32> to vector<1x8x16xf32>
    tpu.vector_store %arg13[%c0_28, %c0_29, %c0_30], %45 {strides = array<i32>} : memref<2x8x16xf32, #tpu.memory_space<vmem>>, vector<1x8x16xf32>,
    %c0_31 = arith.constant 0 : index
    %c0_32 = arith.constant 0 : index
    %c0_33 = arith.constant 0 : index
    %46 = vector.load %arg11[%c0_31, %c0_32, %c0_33] : memref<2x8x1xf32, #tpu.memory_space<vmem>>, vector<1x8x1xf32>
    %47 = vector.shape_cast %46 : vector<1x8x1xf32> to vector<8x1xf32>
    %48 = vector.shape_cast %22 : vector<8x1xf32> to vector<1x8x1xf32>
    tpu.vector_store %arg11[%c0_31, %c0_32, %c0_33], %48 {strides = array<i32>} : memref<2x8x1xf32, #tpu.memory_space<vmem>>, vector<1x8x1xf32>,
    %49 = vector.extract_strided_slice %4 {offsets = [0, 16], sizes = [8, 16], strides = [1, 1]} : vector<8x32xf32> to vector<8x16xf32>
    %c1 = arith.constant 1 : index
    %c0_34 = arith.constant 0 : index
    %c0_35 = arith.constant 0 : index
    %50 = vector.load %arg7[%c1, %c0_34, %c0_35] : memref<2x16x32xf32, #tpu.memory_space<vmem>>, vector<1x16x32xf32>
    %51 = vector.shape_cast %50 : vector<1x16x32xf32> to vector<16x32xf32>
    %cst_36 = arith.constant dense<0.000000e+00> : vector<8x32xf32>
    %52 = tpu.matmul %49, %51, %cst_36 {dimension_numbers = #tpu.dot_dimension_numbers<[1], [0], [0], [1], [0, 0, 1, 1], [], []>} : vector<8x16xf32>, vector<16x32xf32>, vector<8x32xf32> -> vector<8x32xf32>
    %c1_37 = arith.constant 1 : index
    %c0_38 = arith.constant 0 : index
    %c0_39 = arith.constant 0 : index
    %53 = vector.load %arg8[%c1_37, %c0_38, %c0_39] : memref<2x1x32xf32, #tpu.memory_space<vmem>>, vector<1x1x32xf32>
    %54 = vector.shape_cast %53 : vector<1x1x32xf32> to vector<1x32xf32>
    %55 = vector.broadcast %54 : vector<1x32xf32> to vector<8x32xf32>
    %56 = arith.addf %52, %55 : vector<8x32xf32>
    %57 = vector.extract_strided_slice %56 {offsets = [0, 0], sizes = [8, 16], strides = [1, 1]} : vector<8x32xf32> to vector<8x16xf32>
    %58 = vector.extract_strided_slice %56 {offsets = [0, 16], sizes = [8, 16], strides = [1, 1]} : vector<8x32xf32> to vector<8x16xf32>
    %c1_40 = arith.constant 1 : index
    %c0_41 = arith.constant 0 : index
    %c0_42 = arith.constant 0 : index
    %59 = vector.load %arg10[%c1_40, %c0_41, %c0_42] : memref<2x8x16xf32, #tpu.memory_space<vmem>>, vector<1x8x16xf32>
    %60 = vector.shape_cast %59 : vector<1x8x16xf32> to vector<8x16xf32>
    %cst_43 = arith.constant dense<0.000000e+00> : vector<8x8xf32>
    %61 = tpu.matmul %60, %57, %cst_43 {dimension_numbers = #tpu.dot_dimension_numbers<[1], [1], [0], [0], [0, 0, 1, 0], [], []>} : vector<8x16xf32>, vector<8x16xf32>, vector<8x8xf32> -> vector<8x8xf32>
    %c1_44 = arith.constant 1 : index
    %c0_45 = arith.constant 0 : index
    %c0_46 = arith.constant 0 : index
    %62 = vector.load %arg11[%c1_44, %c0_45, %c0_46] : memref<2x8x1xf32, #tpu.memory_space<vmem>>, vector<1x8x1xf32>
    %63 = vector.shape_cast %62 : vector<1x8x1xf32> to vector<8x1xf32>
    %cst_47 = arith.constant dense<0xFF800000> : vector<8xf32>
    %64 = vector.multi_reduction <maximumf>, %61, %cst_47 [1] : vector<8x8xf32> to vector<8xf32>
    %65 = vector.shape_cast %64 : vector<8xf32> to vector<8x1xf32>
    %66 = arith.maximumf %63, %65 : vector<8x1xf32>
    %67 = arith.subf %63, %66 : vector<8x1xf32>
    %68 = math.exp %67 : vector<8x1xf32>
    %69 = vector.broadcast %66 : vector<8x1xf32> to vector<8x8xf32>
    %70 = arith.subf %61, %69 : vector<8x8xf32>
    %71 = math.exp %70 : vector<8x8xf32>
    %c1_48 = arith.constant 1 : index
    %c0_49 = arith.constant 0 : index
    %c0_50 = arith.constant 0 : index
    %72 = vector.load %arg12[%c1_48, %c0_49, %c0_50] : memref<2x8x1xf32, #tpu.memory_space<vmem>>, vector<1x8x1xf32>
    %73 = vector.shape_cast %72 : vector<1x8x1xf32> to vector<8x1xf32>
    %74 = arith.mulf %68, %73 : vector<8x1xf32>
    %cst_51 = arith.constant dense<0.000000e+00> : vector<8xf32>
    %75 = vector.multi_reduction <add>, %71, %cst_51 [1] : vector<8x8xf32> to vector<8xf32>
    %76 = vector.shape_cast %75 : vector<8xf32> to vector<8x1xf32>
    %77 = arith.addf %74, %76 : vector<8x1xf32>
    %c1_52 = arith.constant 1 : index
    %c0_53 = arith.constant 0 : index
    %c0_54 = arith.constant 0 : index
    %78 = vector.load %arg12[%c1_52, %c0_53, %c0_54] : memref<2x8x1xf32, #tpu.memory_space<vmem>>, vector<1x8x1xf32>
    %79 = vector.shape_cast %78 : vector<1x8x1xf32> to vector<8x1xf32>
    %80 = vector.shape_cast %77 : vector<8x1xf32> to vector<1x8x1xf32>
    tpu.vector_store %arg12[%c1_52, %c0_53, %c0_54], %80 {strides = array<i32>} : memref<2x8x1xf32, #tpu.memory_space<vmem>>, vector<1x8x1xf32>,
    %c1_55 = arith.constant 1 : index
    %c0_56 = arith.constant 0 : index
    %c0_57 = arith.constant 0 : index
    %81 = vector.load %arg13[%c1_55, %c0_56, %c0_57] : memref<2x8x16xf32, #tpu.memory_space<vmem>>, vector<1x8x16xf32>
    %82 = vector.shape_cast %81 : vector<1x8x16xf32> to vector<8x16xf32>
    %83 = vector.broadcast %68 : vector<8x1xf32> to vector<8x16xf32>
    %84 = arith.mulf %83, %82 : vector<8x16xf32>
    %cst_58 = arith.constant dense<0.000000e+00> : vector<8x16xf32>
    %85 = tpu.matmul %71, %58, %cst_58 {dimension_numbers = #tpu.dot_dimension_numbers<[1], [0], [0], [1], [0, 0, 1, 1], [], []>} : vector<8x8xf32>, vector<8x16xf32>, vector<8x16xf32> -> vector<8x16xf32>
    %86 = arith.addf %84, %85 : vector<8x16xf32>
    %c1_59 = arith.constant 1 : index
    %c0_60 = arith.constant 0 : index
    %c0_61 = arith.constant 0 : index
    %87 = vector.load %arg13[%c1_59, %c0_60, %c0_61] : memref<2x8x16xf32, #tpu.memory_space<vmem>>, vector<1x8x16xf32>
    %88 = vector.shape_cast %87 : vector<1x8x16xf32> to vector<8x16xf32>
    %89 = vector.shape_cast %86 : vector<8x16xf32> to vector<1x8x16xf32>
    tpu.vector_store %arg13[%c1_59, %c0_60, %c0_61], %89 {strides = array<i32>} : memref<2x8x16xf32, #tpu.memory_space<vmem>>, vector<1x8x16xf32>,
    %c1_62 = arith.constant 1 : index
    %c0_63 = arith.constant 0 : index
    %c0_64 = arith.constant 0 : index
    %90 = vector.load %arg11[%c1_62, %c0_63, %c0_64] : memref<2x8x1xf32, #tpu.memory_space<vmem>>, vector<1x8x1xf32>
    %91 = vector.shape_cast %90 : vector<1x8x1xf32> to vector<8x1xf32>
    %92 = vector.shape_cast %66 : vector<8x1xf32> to vector<1x8x1xf32>
    tpu.vector_store %arg11[%c1_62, %c0_63, %c0_64], %92 {strides = array<i32>} : memref<2x8x1xf32, #tpu.memory_space<vmem>>, vector<1x8x1xf32>,
    %c0_i32_65 = arith.constant 0 : i32
    %93 = arith.cmpi eq, %arg2, %c0_i32_65 : i32
    %94 = arith.extui %93 : i1 to i32
    %c0_i32_66 = arith.constant 0 : i32
    %95 = arith.cmpi ne, %94, %c0_i32_66 : i32
    scf.if %95 {
      %c0_67 = arith.constant 0 : index
      %c0_68 = arith.constant 0 : index
      %c0_69 = arith.constant 0 : index
      %96 = vector.load %arg12[%c0_67, %c0_68, %c0_69] : memref<2x8x1xf32, #tpu.memory_space<vmem>>, vector<1x8x1xf32>
      %97 = vector.shape_cast %96 : vector<1x8x1xf32> to vector<8x1xf32>
      %98 = tpu.reciprocal %97 {approx = true} : vector<8x1xf32> -> vector<8x1xf32>
      %99 = arith.mulf %97, %98 : vector<8x1xf32>
      %cst_70 = arith.constant 2.000000e+00 : f32
      %100 = vector.broadcast %cst_70 : f32 to vector<8x1xf32>
      %101 = arith.subf %100, %99 : vector<8x1xf32>
      %102 = arith.mulf %98, %101 : vector<8x1xf32>
      %c0_71 = arith.constant 0 : index
      %c0_72 = arith.constant 0 : index
      %c0_73 = arith.constant 0 : index
      %103 = vector.load %arg13[%c0_71, %c0_72, %c0_73] : memref<2x8x16xf32, #tpu.memory_space<vmem>>, vector<1x8x16xf32>
      %104 = vector.shape_cast %103 : vector<1x8x16xf32> to vector<8x16xf32>
      %105 = vector.broadcast %102 : vector<8x1xf32> to vector<8x16xf32>
      %106 = arith.mulf %104, %105 : vector<8x16xf32>
      %c1_74 = arith.constant 1 : index
      %c0_75 = arith.constant 0 : index
      %c0_76 = arith.constant 0 : index
      %107 = vector.load %arg12[%c1_74, %c0_75, %c0_76] : memref<2x8x1xf32, #tpu.memory_space<vmem>>, vector<1x8x1xf32>
      %108 = vector.shape_cast %107 : vector<1x8x1xf32> to vector<8x1xf32>
      %109 = tpu.reciprocal %108 {approx = true} : vector<8x1xf32> -> vector<8x1xf32>
      %110 = arith.mulf %108, %109 : vector<8x1xf32>
      %cst_77 = arith.constant 2.000000e+00 : f32
      %111 = vector.broadcast %cst_77 : f32 to vector<8x1xf32>
      %112 = arith.subf %111, %110 : vector<8x1xf32>
      %113 = arith.mulf %109, %112 : vector<8x1xf32>
      %c1_78 = arith.constant 1 : index
      %c0_79 = arith.constant 0 : index
      %c0_80 = arith.constant 0 : index
      %114 = vector.load %arg13[%c1_78, %c0_79, %c0_80] : memref<2x8x16xf32, #tpu.memory_space<vmem>>, vector<1x8x16xf32>
      %115 = vector.shape_cast %114 : vector<1x8x16xf32> to vector<8x16xf32>
      %116 = vector.broadcast %113 : vector<8x1xf32> to vector<8x16xf32>
      %117 = arith.mulf %115, %116 : vector<8x16xf32>
      %118 = tpu.concatenate %106, %117 in 1 : vector<8x16xf32>, vector<8x16xf32> -> vector<8x32xf32>
      %c0_81 = arith.constant 0 : index
      %c0_82 = arith.constant 0 : index
      %c0_83 = arith.constant 0 : index
      %119 = vector.load %arg9[%c0_81, %c0_82, %c0_83] : memref<1x8x32xf32, #tpu.memory_space<vmem>>, vector<1x8x32xf32>
      %120 = vector.shape_cast %119 : vector<1x8x32xf32> to vector<8x32xf32>
      %121 = vector.shape_cast %118 : vector<8x32xf32> to vector<1x8x32xf32>
      tpu.vector_store %arg9[%c0_81, %c0_82, %c0_83], %121 {strides = array<i32>} : memref<1x8x32xf32, #tpu.memory_space<vmem>>, vector<1x8x32xf32>,
    } else {
    }
    return
  }
  func.func @transform_0(%arg0: i32, %arg1: i32, %arg2: i32) -> (i32, i32, i32) {
    %c0_i32 = arith.constant 0 : i32
    %c0_i32_0 = arith.constant 0 : i32
    return %arg0, %arg1, %c0_i32 : i32, i32, i32
  }
  func.func @transform_1(%arg0: i32, %arg1: i32, %arg2: i32) -> (i32, i32, i32) {
    %c0_i32 = arith.constant 0 : i32
    %c0_i32_0 = arith.constant 0 : i32
    return %arg0, %arg2, %c0_i32 : i32, i32, i32
  }
  func.func @transform_2(%arg0: i32, %arg1: i32, %arg2: i32) -> (i32, i32, i32) {
    %c0_i32 = arith.constant 0 : i32
    %c0_i32_0 = arith.constant 0 : i32
    %c0_i32_1 = arith.constant 0 : i32
    %c0_i32_2 = arith.constant 0 : i32
    return %c0_i32, %c0_i32_0, %c0_i32_1 : i32, i32, i32
  }
  func.func @transform_3(%arg0: i32, %arg1: i32, %arg2: i32) -> (i32, i32, i32) {
    %c0_i32 = arith.constant 0 : i32
    %c0_i32_0 = arith.constant 0 : i32
    %c0_i32_1 = arith.constant 0 : i32
    %c0_i32_2 = arith.constant 0 : i32
    return %c0_i32, %c0_i32_0, %c0_i32_1 : i32, i32, i32
  }
  func.func @transform_4(%arg0: i32, %arg1: i32, %arg2: i32) -> (i32, i32, i32) {
    %c0_i32 = arith.constant 0 : i32
    %c0_i32_0 = arith.constant 0 : i32
    %c0_i32_1 = arith.constant 0 : i32
    %c0_i32_2 = arith.constant 0 : i32
    return %c0_i32, %c0_i32_0, %c0_i32_1 : i32, i32, i32
  }
  func.func @transform_5(%arg0: i32, %arg1: i32, %arg2: i32) -> (i32, i32, i32) {
    %c0_i32 = arith.constant 0 : i32
    %c0_i32_0 = arith.constant 0 : i32
    %c0_i32_1 = arith.constant 0 : i32
    %c0_i32_2 = arith.constant 0 : i32
    return %c0_i32, %c0_i32_0, %c0_i32_1 : i32, i32, i32
  }
  func.func @transform_6(%arg0: i32, %arg1: i32, %arg2: i32) -> (i32, i32, i32) {
    %c0_i32 = arith.constant 0 : i32
    %c0_i32_0 = arith.constant 0 : i32
    return %arg0, %arg1, %c0_i32 : i32, i32, i32
  }
}

</mosaic_0001>

<bundles_post_ra>
// kernel: tpu_custom_call.1
= control target key start
LH: loop header
LB: loop body
LE: loop exit
PB: predicated region body
PF: predicated region fallthrough
CT: control target
= control target key end

     0   :  { %s2116_s0 = inlined_call_operand.hbm [shape: f32[2,8,32], index: 0, kind: input, shape index: {}]   ;;  %s2117_s1 = inlined_call_operand.hbm [shape: f32[2,8,32], index: 1, kind: input, shape index: {}]   ;;  %s2118_s2 = inlined_call_operand.hbm [shape: f32[2,16,16], index: 2, kind: input, shape index: {}]   ;;  %s2119_s3 = inlined_call_operand.vmem [shape: f32[2,1,16], index: 3, kind: input, shape index: {}]   ;;  %s2120_s4 = inlined_call_operand.hbm [shape: f32[2,16,32], index: 4, kind: input, shape index: {}]   ;;  %s2121_s5 = inlined_call_operand.vmem [shape: f32[2,1,32], index: 5, kind: input, shape index: {}]   ;;  %s2122_s6 = inlined_call_operand.hbm [shape: f32[2,8,32], index: 6, kind: output, shape index: {}]  }
   0x1   :  { %2129 = sst [smem:[#allocation23_spill]] %s2118_s2 }
   0x2   :  { %2130 = sst [smem:[#allocation24_spill]] %s2120_s4 }
   0x3   :  { %11 = vsyncpa [#allocation7], 0 }
   0x4   :  { %13 = vsyncpa [#allocation7 + $0x1], 0 }
   0x5   :  { %14 = vsyncpa [#allocation10], 0 }
   0x6   :  { %16 = vsyncpa [#allocation10 + $0x1], 0 }
   0x7   :  { %17 = vsyncpa [#allocation13], 0 }
   0x8   :  { %18 = vsyncpa [#allocation8], 0 }
   0x9   :  { %20 = vsyncpa [#allocation8 + $0x1], 0  ;;  %s1753_s21 = smov 0   ;;  %s1755_s22 = smov 0  }
   0xa   :  { %s1757_s23 = smov 0   ;;  %s1759_s24 = smov 0  }
   0xb   :  { %s1761_s25 = smov 0   ;;  %s1763_s26 = smov 0  }
   0xc LB: > { %2131 = sst [smem:[#allocation20_spill]] %s1698_s25  ;;  %s1784_s27 = sadd.s32 4294967295, %s1702_s26   ;;  %s1702_s26 = sphi %s1763_s26, %s26_s26   ;;  %s1698_s25 = sphi %s1761_s25, %s2154_s25   ;;  %s1694_s24 = sphi %s1759_s24, %s2153_s24   ;;  %s1690_s23 = sphi %s1757_s23, %s2157_s23   ;;  %s1686_s22 = sphi %s1755_s22, %s2156_s22   ;;  %s1682_s21 = sphi %s1753_s21, %s2155_s21  }
   0xd   : > { %s1266_s28 = sadd.s32 4294967294, %s1702_s26   ;;  %p67_p0 = scmp.ne.s32.totalorder %s1686_s22, %s1682_s21 }
   0xe   : > { %p2123_p1 = scmp.eq.s32.totalorder %s1784_s27, 0  ;;  %p211_p3 = scmp.eq.s32.totalorder %s1266_s28, 1 }
   0xf   : > { %p1267_p5 = scmp.ge.s32.totalorder %s1702_s26, 1  ;;  %p218_p7 = scmp.lt.s32.totalorder %s1702_s26, 3 }
  0x10   : > { %p1793_p4 = por %p2123_p1, %p67_p0  ;;  %p1798_p6 = por %p211_p3, %p67_p0 }
  0x11   : > { %p1803_p8 = pnand %p1267_p5, %p218_p7  ;;  %s1704_s8 = smov [#allocation11]  }
  0x12   : > { %s2132_s29 = scalar_select %p1793_p4, 1, 0 }
  0x13   : > { %s2133_s30 = scalar_select %p1798_p6, 1, 0 }
  0x14   : > { %s2134_s7 = scalar_select %p1803_p8, 1, 0 }
  0x15   : > { %s230_s9 = sshll.u32 %s1704_s8, 4  ;;  %p1395_p9 = pneg %p1803_p8  ;;  %s1807_s9 = int_to_ptr.vmem [resolvable:$true] %s230_s9 }
  0x16   : > { %s1705_s11 = smov [#allocation12]   ;;  %s2136_s2 = sld [smem:[#allocation23_spill]] }
  0x17   : > { %p1814_p11 = pnand %p1395_p9, %p2123_p1  ;;  %s246_s12 = sshll.u32 %s1705_s11, 4  ;;  %s1818_s12 = int_to_ptr.vmem [resolvable:$true] %s246_s12 }
  0x19   : > { %p1494_p13 = pneg %p1814_p11 }
  0x1c   : > { %s1492_s15 = scalar_lea.hbm %s2136_s2, 512 }
  0x1d   : > { %p1493_p12 = scmp.ne.s32.totalorder %s2136_s2, %s1492_s15  ;;  %p1499_p5 = scmp.lt.u32.totalorder %s1492_s15, %s2136_s2 }
  0x1f   : > { %p1495_p0 = pnand %p1494_p13, %p1493_p12 }
  0x21   : > { %p1496_p3 = pneg %p1495_p0 }
  0x23   : > { %p1501_p7 = pnand %p1499_p5, %p1496_p3 }
  0x25   : > { %1504 = shalt.err (!%p1501_p7)
}
  0x26   : > { %s1505_s20 = scalar_lea.vmem %s1807_s9, 512  ;;  %p1513_p2 = scmp.lt.s32.totalorder %s1807_s9, %s1807_s9 }
  0x27   : > { %p1506_p9 = scmp.ne.s32.totalorder %s1807_s9, %s1505_s20  ;;  %p1514_p12 = scmp.lt.s32.totalorder %s1505_s20, %s1505_s20 }
  0x29   : > { %p1508_p10 = pnand %p1506_p9, %p1494_p13  ;;  %p1515_p0 = por %p1514_p12, %p1513_p2 }
  0x2b   : > { %p1509_p1 = pneg %p1508_p10 }
  0x2d   : > { %p1516_p6 = pnand %p1515_p0, %p1509_p1 }
  0x2f   : > { %1519 = shalt.err (!%p1516_p6)
}
  0x30   : > { %s1706_s28 = smov 128   ;;  %s1707_s8 = smov 8  }
  0x31   : > { %1398 = dma.hbm_to_vmem [thread:$0]  (!%p1814_p11), %s2136_s2, 512, %s1807_s9, [#allocation10], %s1706_s28, %s1706_s28, %s1707_s8  }
  0x32   : > { %s2137_s4 = sld [smem:[#allocation24_spill]] }
  0x38   : > { %s1520_s16 = scalar_lea.hbm %s2137_s4, 512 }
  0x39   : > { %p1521_p2 = scmp.ne.s32.totalorder %s2137_s4, %s1520_s16  ;;  %p1527_p10 = scmp.lt.u32.totalorder %s1520_s16, %s2137_s4 }
  0x3b   : > { %p1523_p1 = pnand %p1521_p2, %p1494_p13 }
  0x3d   : > { %p1524_p6 = pneg %p1523_p1 }
  0x3f   : > { %p1529_p3 = pnand %p1527_p10, %p1524_p6 }
  0x41   : > { %1532 = shalt.err (!%p1529_p3)
}
  0x42   : > { %s1533_s9 = scalar_lea.vmem %s1818_s12, 512  ;;  %p1541_p12 = scmp.lt.s32.totalorder %s1818_s12, %s1818_s12 }
  0x43   : > { %p1534_p5 = scmp.ne.s32.totalorder %s1818_s12, %s1533_s9  ;;  %p1542_p0 = scmp.lt.s32.totalorder %s1533_s9, %s1533_s9 }
  0x45   : > { %p1536_p7 = pnand %p1534_p5, %p1494_p13  ;;  %p1543_p2 = por %p1542_p0, %p1541_p12 }
  0x47   : > { %p1537_p9 = pneg %p1536_p7 }
  0x49   : > { %p1544_p1 = pnand %p1543_p2, %p1537_p9 }
  0x4b   : > { %1547 = shalt.err (!%p1544_p1)
}
  0x4c   : > { %1401 = dma.hbm_to_vmem [thread:$0]  (!%p1814_p11), %s2137_s4, 512, %s1818_s12, [#allocation13], %s1706_s28, %s1706_s28, %s1707_s8  }
  0x4d   : > { %s45_s14 = sadd.s32 1, %s1698_s25  ;;  %s54_s15 = sadd.s32 1, %s1690_s23 }
  0x4e   : > { %p47_p13 = scmp.ge.s32.totalorder %s45_s14, 2  ;;  %p61_p6 = scmp.ne.s32.totalorder %s1690_s23, %s1686_s22 }
  0x4f   : > { %p62_p10 = scmp.eq.s32.totalorder %s1702_s26, 0  ;;  %p1415_p3 = scmp.lt.s32.totalorder %s1702_s26, 2 }
  0x50   : > { %s2159_s14 = smov (%p47_p13, %s45_s14), 0  ;;  %p2139_p7 = scmp.eq.s32.totalorder %s1784_s27, 1 }
  0x51   : > { %2138 = sst [smem:[#allocation21_spill]] %s2159_s14  ;;  %p63_p5 = por %p62_p10, %p61_p6 }
  0x52   : > { %p1882_p9 = por %p2139_p7, %p61_p6  ;;  %s49_s16 = ssub.s32 %s1698_s25, %s2159_s14 }
  0x53   : > { %s263_s17 = sand.u32 1, %s1690_s23   ;;  %p52_p12 = scmp.eq.s32.totalorder %s49_s16, 0 }
  0x54   : > { %s2140_s10 = scalar_select %p1882_p9, 1, 0 }
  0x55   : > { %s1889_s12 = sshll.u32 %s263_s17, 3  ;;  %s1272_s28 = sshll.u32 %s1698_s25, 7 }
  0x56   : > { %s1893_s8 = scalar_select %p52_p12, %s1690_s23, %s54_s15  }
  0x57   : > { %s1898_s20 = scalar_lea.hbm %s2116_s0, %s1272_s28  ;;  %s267_s9 = scalar_lea.vmem [#allocation6], %s1889_s12 }
  0x58   : > { %2141 = sst [smem:[#allocation22_spill]] %s1893_s8  ;;  %s275_s11 = sshll.u32 %s267_s9, 4  ;;  %s1907_s11 = int_to_ptr.vmem [resolvable:$true] %s275_s11 }
  0x59   : > { %p1903_p11 = pnand %p1415_p3, %p63_p5  ;;  %s1912_s18 = scalar_lea.hbm %s2117_s1, %s1272_s28 }
  0x5a   : > { %s264_s19 = scalar_lea.sflag [#allocation7], %s263_s17  ;;  %s1548_s2 = scalar_lea.hbm %s1898_s20, 128 }
  0x5b   : > { %p1549_p0 = scmp.ne.s32.totalorder %s1898_s20, %s1548_s2  ;;  %p1550_p2 = pneg %p1903_p11 }
  0x5c   : > { %s1553_s14 = scalar_lea.hbm %s2116_s0, 256  ;;  %p1554_p6 = scmp.lt.u32.totalorder %s1898_s20, %s2116_s0 }
  0x5d   : > { %p1551_p1 = pnand %p1550_p2, %p1549_p0  ;;  %p1555_p10 = scmp.lt.u32.totalorder %s1553_s14, %s1548_s2 }
  0x5e   : > { %p1557_p5 = scmp.lt.u32.totalorder %s1548_s2, %s1898_s20 }
  0x5f   : > { %p1552_p13 = pneg %p1551_p1  ;;  %p1556_p3 = por %p1555_p10, %p1554_p6 }
  0x61   : > { %p1558_p7 = por %p1557_p5, %p1556_p3 }
  0x63   : > { %p1559_p12 = pnand %p1558_p7, %p1552_p13 }
  0x65   : > { %1562 = shalt.err (!%p1559_p12)
}
  0x66   : > { %s1563_s17 = scalar_lea.vmem %s1907_s11, 128  ;;  %s1708_s4 = smov [#allocation6]  }
  0x67   : > { %p1564_p0 = scmp.ne.s32.totalorder %s1907_s11, %s1563_s17  ;;  %s1568_s28 = sshll.u32 %s1708_s4, 4  ;;  %s1569_s28 = int_to_ptr.vmem [resolvable:$false] %s1568_s28 }
  0x68   : > { %s1570_s25 = scalar_lea.vmem %s1569_s28, 256  ;;  %p1571_p4 = scmp.lt.s32.totalorder %s1907_s11, %s1569_s28 }
  0x69   : > { %p1566_p1 = pnand %p1564_p0, %p1550_p2  ;;  %p1572_p6 = scmp.lt.s32.totalorder %s1570_s25, %s1563_s17 }
  0x6b   : > { %p1567_p9 = pneg %p1566_p1  ;;  %p1573_p10 = por %p1572_p6, %p1571_p4 }
  0x6d   : > { %p1574_p3 = pnand %p1573_p10, %p1567_p9 }
  0x6f   : > { %1577 = shalt.err (!%p1574_p3)
}
  0x70   : > { %1405 = dma.hbm_to_vmem [thread:$0]  (!%p1903_p11), %s1898_s20, 128, %s1907_s11, %s264_s19  }
  0x71   : > { %s282_s2 = sand.u32 1, %s1702_s26   ;;  %s286_s14 = scalar_lea.vmem [#allocation9], %s1889_s12 }
  0x72   : > { %s294_s8 = sshll.u32 %s286_s14, 4  ;;  %s283_s15 = scalar_lea.sflag [#allocation10], %s282_s2  ;;  %s295_s8 = int_to_ptr.vmem [resolvable:$true] %s294_s8 }
  0x73   : > { %s1578_s16 = scalar_lea.hbm %s1912_s18, 128  ;;  %s1583_s4 = scalar_lea.hbm %s2117_s1, 256 }
  0x74   : > { %p1579_p4 = scmp.ne.s32.totalorder %s1912_s18, %s1578_s16  ;;  %p1584_p5 = scmp.lt.u32.totalorder %s1912_s18, %s2117_s1 }
  0x75   : > { %p1585_p7 = scmp.lt.u32.totalorder %s1583_s4, %s1578_s16  ;;  %p1587_p0 = scmp.lt.u32.totalorder %s1578_s16, %s1912_s18 }
  0x76   : > { %p1581_p9 = pnand %p1579_p4, %p1550_p2 }
  0x77   : > { %p1586_p12 = por %p1585_p7, %p1584_p5 }
  0x78   : > { %p1582_p13 = pneg %p1581_p9 }
  0x79   : > { %p1588_p1 = por %p1587_p0, %p1586_p12 }
  0x7b   : > { %p1589_p6 = pnand %p1588_p1, %p1582_p13 }
  0x7d   : > { %1592 = shalt.err (!%p1589_p6)
}
  0x7e   : > { %s1593_s12 = scalar_lea.vmem %s295_s8, 128  ;;  %s1709_s20 = smov [#allocation9]  }
  0x7f   : > { %p1594_p10 = scmp.ne.s32.totalorder %s295_s8, %s1593_s12  ;;  %s1598_s11 = sshll.u32 %s1709_s20, 4  ;;  %s1599_s11 = int_to_ptr.vmem [resolvable:$false] %s1598_s11 }
  0x80   : > { %s1600_s19 = scalar_lea.vmem %s1599_s11, 256  ;;  %p1601_p9 = scmp.lt.s32.totalorder %s295_s8, %s1599_s11 }
  0x81   : > { %p1596_p3 = pnand %p1594_p10, %p1550_p2  ;;  %p1602_p8 = scmp.lt.s32.totalorder %s1600_s19, %s1593_s12 }
  0x83   : > { %p1597_p4 = pneg %p1596_p3  ;;  %p1603_p5 = por %p1602_p8, %p1601_p9 }
  0x85   : > { %p1604_p7 = pnand %p1603_p5, %p1597_p4 }
  0x87   : > { %1607 = shalt.err (!%p1604_p7)
}
  0x88   : > { %1408 = dma.hbm_to_vmem [thread:$0]  (!%p1903_p11), %s1912_s18, 128, %s295_s8, %s283_s15  }
  0x89   : > { %p2143_p13 = scmp.ne.s32.totalorder %s2134_s7, 0 }
  0x8a   : > { %s1963_s2 = sand.u32 (!%p2143_p13), 1, %s1686_s22   ;;  %p2144_p8 = scmp.ne.s32.totalorder (!%p2143_p13), %s2132_s29, 0 }
  0x8b   : > { %303 = sbr.rel (%p2143_p13) target bundleno = 1820 (0x71c), region = 44  ;;  %s1966_s14 = sshll.u32 (!%p2143_p13), %s1963_s2, 3 }
  0x8c   : > { %s306_s16 = scalar_lea.sflag (!%p2143_p13), [#allocation7], %s1963_s2  ;;  %s309_s9 = scalar_lea.vmem (!%p2143_p13), [#allocation6], %s1966_s14 }
  0x92   : > { %1661 = dma.done.wait (%p2144_p8), %s306_s16, 128  }
  0x93   : > { %1663 = vsyncadd (%p2144_p8), %s306_s16, 4294967168  ;;  %s314_s7 = sand.u32 1, %s1784_s27   ;;  %s318_s18 = scalar_lea.vmem [#allocation9], %s1966_s14 }
  0x94   : > { %s315_s13 = scalar_lea.sflag [#allocation10], %s314_s7 }
  0x95   : > { %1665 = dma.done.wait (%p2144_p8), %s315_s13, 128  }
  0x96   : > { %1667 = vsyncadd (%p2144_p8), %s315_s13, 4294967168  ;;  %p2145_p11 = scmp.eq.s32.totalorder %s1784_s27, 0 }
  0x98   : > { %1669 = dma.done.wait (%p2145_p11), [#allocation10], 512   ;;  %p2146_p2 = pmov %p2145_p11 }
  0x9a   : > { %1671 = vsyncadd (%p2146_p2), [#allocation10], 4294966784  ;;  %p2147_p12 = pmov %p2146_p2 }
  0x9b   : > { %p2148_p0 = pmov %p2146_p2 }
  0x9c   : > { %1673 = dma.done.wait (%p2147_p12), [#allocation13], 512  }
  0x9d   : > { %1675 = vsyncadd (%p2148_p0), [#allocation13], 4294966784  ;;  %vm374_vm0 = vcmask 130048   ;;  %v1710_v0 = vmov 0.0|0.0   ;;  %vm1711_vm1 = vmmov 0   ;;  %v1712_v1 = vmov 0.0  }
  0x9e   : > { %1369 = vmatprep.subr.bf16.mxu0 %v1710_v0  ;;  %1325 = vmatprep.mubr.msk.f32.mxu0 %vm1711_vm1, %v1712_v1  ;;  %541 = vst.msk [vmem:[#allocation5] sm:$0xff] %vm374_vm0, %v1712_v1  ;;  %542 = vst.msk [vmem:[#allocation5 + $0x8] sm:$0xff] %vm374_vm0, %v1712_v1  ;;  %v365_v2 = vld [vmem:[#allocation11] sm:$0xff]  ;;  %v366_v3 = vld [vmem:[#allocation11 + $0x8] sm:$0xff]  ;;  %s1713_s27 = smov 112   ;;  %vm536_vm2 = vcmask 7168  }
  0x9f   : > { %1372 = vmatprep.subr.bf16.mxu1 %v1710_v0  ;;  %1332 = vmatprep.mubr.msk.f32.mxu1 %vm1711_vm1, %v1712_v1  ;;  %v364_v4 = vld [vmem:[%s309_s9] sm:$0xff]  ;;  %v1370_v5 = vpack.c.bf16 %v366_v3, %v365_v2  ;;  %v450_v8 = vld [vmem:[#allocation11 + $0x10] sm:$0xff]  ;;  %v451_v9 = vld [vmem:[#allocation11 + $0x18] sm:$0xff]  ;;  %v1714_v26 = vmov -inf   ;;  %539 = vst.msk [vmem:[#allocation4] sm:$0xff] %vm536_vm2, %v1712_v1  ;;  %vm705_vm3 = vcmask 64512  }
  0xa0   : > { %v544_v6 = vld [vmem:[#allocation12] sm:$0xff]  ;;  %v545_v7 = vld [vmem:[#allocation12 + $0x8] sm:$0xff]  ;;  %460 = vrot.lane.b32.xlu0 %v364_v4, %s1713_s27  ;;  %v1373_v11 = vpack.c.bf16 %v451_v9, %v450_v8  ;;  %v543_v12 = vld [vmem:[%s318_s18] sm:$0xff]  ;;  %537 = vst.msk [vmem:[#allocation3] sm:$0xff] %vm536_vm2, %v1714_v26  ;;  %v1715_v36 = vmov 0   ;;  %s1716_s20 = smov 16  }
  0xa1   : > { %1371 = vmatpush3.bf16.msra.mxu0 %v1370_v5  ;;  %v1376_v10 = vpack.c.bf16 %v545_v7, %v544_v6  ;;  %v1281_v14 = vld [vmem:[%s2119_s3] ss:$0 sm:$0xff]  ;;  %v816_v23 = vld [vmem:[#allocation12 + $0x10] sm:$0xff]  ;;  %v817_v24 = vld [vmem:[#allocation12 + $0x18] sm:$0xff]  ;;  %538 = vst.msk [vmem:[#allocation3 + $0x8] sm:$0xff] %vm536_vm2, %v1714_v26  ;;  %1478 = vset.pattern.permute.xlu1 %v1715_v36  ;;  %s1298_s11 = sshll.u32 %s1694_s24, 7 }
  0xa2   : > { %1375 = vmatprep.subr.bf16.mxu0 %v1710_v0  ;;  %1374 = vmatpush3.bf16.msra.mxu1 %v1373_v11  ;;  %v1286_v18 = vld [vmem:[%s2121_s5] ss:$0 sm:$0xff]  ;;  %v1379_v25 = vpack.c.bf16 %v817_v24, %v816_v23  ;;  %540 = vst.msk [vmem:[#allocation4 + $0x8] sm:$0xff] %vm536_vm2, %v1712_v1  ;;  %v1284_v28 = vld [vmem:[%s2119_s3 + $0x1] ss:$0 sm:$0xff]  ;;  %s359_s19 = scalar_lea.vmem [#allocation14], %s1966_s14  ;;  %s2066_s13 = scalar_lea.hbm %s2122_s6, %s1298_s11 }
  0xa3   : > { %1342 = vmatprep.subr.mxu1 %v1712_v1  ;;  %1479 = vset.pattern.permute.xlu0 %v1715_v36  ;;  %v1292_v46 = vld [vmem:[%s2121_s5 + $0x1] ss:$0 sm:$0xff]  ;;  %s1139_s16 = sshll.u32 %s359_s19, 4  ;;  %vm1122_vm4 = vcmask 261120   ;;  %s1125_s18 = scalar_lea.sflag [#allocation8], %s1963_s2  ;;  %s2068_s16 = int_to_ptr.vmem [resolvable:$true] %s1139_s16 }
  0xa4   : > { %826 = vrot.lane.b32.xlu0 %v543_v12, %s1713_s27  ;;  %1326 = vmatmul.mubr.msk.f32.vlgmr.msra.gmra.mrb[0].mxu0 %vm374_vm0, %v364_v4  ;;  %s1608_s24 = scalar_lea.vmem %s2068_s16, 128  ;;  %p2149_p6 = scmp.ne.s32.totalorder %s2140_s10, 0 }
  0xa5   : > { %1377 = vmatpush3.bf16.msra.mxu0 %v1376_v10  ;;  %1339 = vmatprep.mubr.msk.f32.mxu0 %vm1711_vm1, %v1712_v1  ;;  %v1004_v24 = vld [vmem:[#allocation5 + $0x8] sm:$0xff]  ;;  %p1609_p1 = scmp.ne.s32.totalorder %s2068_s16, %s1608_s24  ;;  %s1717_s14 = smov [#allocation14]  }
  0xa6   : > { %1347 = vmatprep.subr.mxu0 %v1712_v1  ;;  %v721_v60 = vld [vmem:[#allocation4] sm:$0xff] }
  0xa7   : > { %v704_v37 = vld [vmem:[#allocation3] sm:$0xff]  ;;  %p1610_p10 = pnand %p1609_p1, %p2149_p6 }
  0xa8   : > { %1340 = vmatmul.mubr.msk.f32.vlgmr.msra.gmra.mrb[2].mxu0 %vm374_vm0, %v543_v12  ;;  %v979_v57 = vld [vmem:[#allocation3 + $0x8] sm:$0xff] }
  0xa9   : > { %1349 = vmatprep.mubr.msk.f32.mxu0 %vm1711_vm1, %v1712_v1  ;;  %v996_v10 = vld [vmem:[#allocation4 + $0x8] sm:$0xff]  ;;  %p1611_p3 = pneg %p1610_p10 }
 0x112   : > { %v461_v13 = vpop.permute.xlu0 %460 }
 0x113   : > { %1333 = vmatmul.mubr.msk.f32.vlgmr.msra.gmra.mrb[0].mxu1 %vm374_vm0, %v461_v13 }
 0x114   : > { %1344 = vmatprep.mubr.msk.f32.mxu1 %vm1711_vm1, %v1712_v1 }
 0x116   : > { %v827_v27 = vpop.permute.xlu0 %826 }
 0x177   : > { %v444_v15 = vpop.f32.mrb[0].mxu0 }
 0x178   : > { %v445_v16 = vadd.f32 %v1281_v14, %v444_v15  ;;  %v1327_v17 = vpop.f32.mrb[1].mxu0 }
 0x17a   : > { %448 = vst.msk [vmem:[#allocation2] sm:$0xff] %vm374_vm0, %v445_v16 }
 0x17b   : > { %v623_v19 = vpop.f32.mrb[2].mxu0 }
 0x17c   : > { %v624_v20 = vadd.f32 %v1286_v18, %v623_v19  ;;  %v1341_v21 = vpop.f32.mrb[3].mxu0 }
 0x17e   : > { %736 = vrot.lane.b32.xlu0 %v624_v20, %s1713_s27  ;;  %1343 = vmatpush3.xpose.msk.msra.mxu1 %vm374_vm0, %v624_v20 }
 0x17f   : > { %1378 = vmatprep.subr.bf16.mxu1 %v1710_v0 }
 0x181   : > { %v627_v22 = vld [vmem:[#allocation2] sm:$0xff] }
 0x182   : > { %1345 = vmatmul.mubr.msk.f32.vlgmr.msra.gmra.mrb[2].mxu1 %vm374_vm0, %v627_v22 }
 0x183   : > { %1356 = vmatprep.mubr.msk.f32.mxu1 %vm1711_vm1, %v1712_v1  ;;  %1380 = vmatpush3.bf16.msra.mxu1 %v1379_v25 }
 0x184   : > { %1364 = vmatprep.subr.mxu1 %v1712_v1 }
 0x186   : > { %1357 = vmatmul.mubr.msk.f32.vlgmr.msra.gmra.mrb[4].mxu1 %vm374_vm0, %v827_v27 }
 0x187   : > { %1366 = vmatprep.mubr.msk.f32.mxu1 %vm1711_vm1, %v1712_v1 }
 0x1e6   : > { %v530_v29 = vpop.f32.mrb[0].mxu1 }
 0x1e7   : > { %v531_v30 = vadd.f32 %v1284_v28, %v530_v29  ;;  %v1334_v31 = vpop.f32.mrb[1].mxu1 }
 0x1e9   : > { %535 = vst.msk [vmem:[#allocation2 + $0x8] sm:$0xff] %vm374_vm0, %v531_v30 }
 0x1f0   : > { %v737_v32 = vpop.permute.xlu0 %736  ;;  %v901_v49 = vld [vmem:[#allocation2 + $0x8] sm:$0xff] }
 0x1f1   : > { %1348 = vmatpush3.msra.mxu0 %v737_v32 }
 0x1f2   : > { %1359 = vmatprep.subr.mxu0 %v1712_v1 }
 0x255   : > { %v700_v33 = vpop.f32.mrb[2].mxu1 }
 0x256   : > { %v1346_v34 = vpop.f32.mrb[3].mxu1  ;;  %v706_v35 = vsel %vm705_vm3, %v700_v33, -inf }
 0x257   : > { %707 = vmax.xlane.f32.xlu1 %v706_v35 }
 0x259   : > { %v896_v41 = vpop.f32.mrb[4].mxu1 }
 0x25a   : > { %v1358_v42 = vpop.f32.mrb[5].mxu1  ;;  %v897_v47 = vadd.f32 %v1292_v46, %v896_v41 }
 0x2e4   : > { %v708_v38 = vpop.xlane.xlu1 %707 }
 0x2e5   : > { %v709_v39 = vmax.f32 %v704_v37, %v708_v38 }
 0x2e7   : > { %v710_v40 = vsub.f32 %v704_v37, %v709_v39  ;;  %814 = vst.msk [vmem:[#allocation3] sm:$0xff] %vm536_vm2, %v709_v39  ;;  %715 = vperm.xlu1 %1478, %v709_v39  }
 0x2e9   : > { %v711_v56 = vmul.f32 1.442695, %v710_v40 }
 0x366   : > { %v716_v43 = vpop.permute.xlu1 %715 }
 0x367   : > { %v718_v44 = vsub.f32 %v700_v33, %v716_v43  ;;  %v729_v33 = vld [vmem:[#allocation5] sm:$0xff] }
 0x369   : > { %v719_v45 = vmul.f32 1.442695, %v718_v44 }
 0x36b   : > { %1480 = vpow2.f32 %v719_v45 }
 0x36c   : > { %1482 = vpow2.f32 %v711_v56 }
 0x375   : > { %v1481_v48 = vpop.eup %1480 }
 0x376   : > { %1350 = vmatmul.mubr.msk.f32.vlgmr.msra.gmra.mrb[4].mxu0 %vm705_vm3, %v1481_v48  ;;  %v723_v55 = vsel %vm705_vm3, %v1481_v48, 0.0  ;;  %v1483_v58 = vpop.eup %1482 }
 0x377   : > { %1360 = vmatpush3.xpose.msk.msra.mxu0 %vm374_vm0, %v897_v47  ;;  %1361 = vmatprep.mubr.msk.f32.mxu0 %vm1711_vm1, %v1712_v1  ;;  %v722_v63 = vmul.f32 %v1483_v58, %v721_v60 }
 0x37a   : > { %1362 = vmatmul.mubr.msk.f32.vlgmr.msra.gmra.mrb[6].mxu0 %vm374_vm0, %v901_v49 }
 0x449   : > { %v2048_v50 = vpop.f32.mrb[4].mxu0 }
 0x44a   : > { %v1351_v51 = vpop.f32.mrb[5].mxu0 }
 0x44d   : > { %v974_v52 = vpop.f32.mrb[6].mxu0 }
 0x44e   : > { %v1363_v53 = vpop.f32.mrb[7].mxu0  ;;  %v980_v54 = vsel %vm705_vm3, %v974_v52, -inf }
 0x44f   : > { %981 = vmax.xlane.f32.xlu0 %v980_v54 }
 0x453   : > { %724 = vadd.xlane.f32.xlu0 %v723_v55 }
 0x4dc   : > { %v982_v59 = vpop.xlane.xlu0 %981 }
 0x4dd   : > { %v983_v61 = vmax.f32 %v979_v57, %v982_v59 }
 0x4df   : > { %v984_v62 = vsub.f32 %v979_v57, %v983_v61  ;;  %1089 = vst.msk [vmem:[#allocation3 + $0x8] sm:$0xff] %vm536_vm2, %v983_v61  ;;  %989 = vperm.xlu1 %1478, %v983_v61  }
 0x4e0   : > { %v725_v0 = vpop.xlane.xlu0 %724 }
 0x4e1   : > { %v985_v1 = vmul.f32 1.442695, %v984_v62  ;;  %v726_v2 = vadd.f32 %v725_v0, %v722_v63 }
 0x4e3   : > { %1484 = vpow2.f32 %v985_v1  ;;  %728 = vst.msk [vmem:[#allocation4] sm:$0xff] %vm536_vm2, %v726_v2  ;;  %1011 = vrot.lane.b32.xlu1 %v897_v47, %s1713_s27  ;;  %s1612_s27 = sshll.u32 %s1717_s14, 4  ;;  %s1613_s27 = int_to_ptr.vmem [resolvable:$false] %s1612_s27 }
 0x4e4   : > { %s1614_s29 = scalar_lea.vmem %s1613_s27, 256  ;;  %p1615_p4 = scmp.lt.s32.totalorder %s2068_s16, %s1613_s27 }
 0x4e5   : > { %p1616_p9 = scmp.lt.s32.totalorder %s1614_s29, %s1608_s24 }
 0x4e7   : > { %p1617_p5 = por %p1616_p9, %p1615_p4 }
 0x4e9   : > { %p1618_p7 = pnand %p1617_p5, %p1611_p3 }
 0x4ea   : > { %v1093_v15 = vld [vmem:[#allocation4] sm:$0xff] }
 0x4ed   : > { %v1485_v3 = vpop.eup %1484 }
 0x4ee   : > { %1007 = vperm.xlu0 %1479, %v1485_v3   ;;  %v997_v11 = vmul.f32 %v1485_v3, %v996_v10 }
 0x55e   : > { %v990_v4 = vpop.permute.xlu1 %989 }
 0x55f   : > { %v992_v5 = vsub.f32 %v974_v52, %v990_v4 }
 0x561   : > { %v993_v6 = vmul.f32 1.442695, %v992_v5 }
 0x562   : > { %v1012_v7 = vpop.permute.xlu1 %1011 }
 0x563   : > { %1486 = vpow2.f32 %v993_v6  ;;  %1365 = vmatpush3.msra.mxu1 %v1012_v7 }
 0x56d   : > { %v1487_v8 = vpop.eup %1486  ;;  %v1008_v25 = vpop.permute.xlu0 %1007 }
 0x56e   : > { %1367 = vmatmul.mubr.msk.f32.vlgmr.msra.gmra.mrb[6].mxu1 %vm705_vm3, %v1487_v8  ;;  %v998_v9 = vsel %vm705_vm3, %v1487_v8, 0.0  ;;  %v1010_v26 = vmul.f32 %v1008_v25, %v1004_v24 }
 0x56f   : > { %999 = vadd.xlane.f32.xlu1 %v998_v9 }
 0x5fc   : > { %v1000_v12 = vpop.xlane.xlu1 %999 }
 0x5fd   : > { %v1001_v13 = vadd.f32 %v1000_v12, %v997_v11 }
 0x5ff   : > { %1002 = vst.msk [vmem:[#allocation4 + $0x8] sm:$0xff] %vm536_vm2, %v1001_v13 }
 0x606   : > { %v1105_v14 = vld [vmem:[#allocation4 + $0x8] sm:$0xff] }
 0x607   : > { %1488 = vrcp.f32 %v1105_v14 }
 0x608   : > { %1490 = vrcp.f32 %v1093_v15 }
 0x611   : > { %v1489_v16 = vpop.eup %1488 }
 0x612   : > { %v1107_v17 = vmul.f32 %v1489_v16, %v1105_v14  ;;  %v1491_v18 = vpop.eup %1490 }
 0x613   : > { %v1095_v21 = vmul.f32 %v1491_v18, %v1093_v15 }
 0x614   : > { %v1108_v19 = vsub.f32 2.0, %v1107_v17 }
 0x615   : > { %v1096_v22 = vsub.f32 2.0, %v1095_v21 }
 0x616   : > { %v1109_v20 = vmul.f32 %v1489_v16, %v1108_v19 }
 0x617   : > { %v1097_v23 = vmul.f32 %v1491_v18, %v1096_v22 }
 0x618   : > { %1113 = vperm.xlu1 %1478, %v1109_v20  }
 0x61c   : > { %732 = vperm.xlu1 %1478, %v1483_v58  }
 0x620   : > { %1101 = vperm.xlu1 %1478, %v1097_v23  }
 0x641   : > { %v1083_v27 = vpop.f32.mrb[6].mxu1 }
 0x642   : > { %v1087_v28 = vadd.f32 %v1083_v27, %v1010_v26  ;;  %v1368_v29 = vpop.f32.mrb[7].mxu1 }
 0x644   : > { %1088 = vst.msk [vmem:[#allocation5 + $0x8] sm:$0xff] %vm374_vm0, %v1087_v28 }
 0x64b   : > { %v1110_v31 = vld [vmem:[#allocation5 + $0x8] sm:$0xff] }
 0x697   : > { %v1114_v30 = vpop.permute.xlu1 %1113 }
 0x698   : > { %v1116_v32 = vmul.f32 %v1114_v30, %v1110_v31 }
 0x69a   : > { %1118 = vrot.lane.b32.xlu1 %v1116_v32, %s1716_s20 }
 0x69b   : > { %v733_v34 = vpop.permute.xlu1 %732 }
 0x69c   : > { %v735_v35 = vmul.f32 %v733_v34, %v729_v33 }
 0x69e   : > { %v812_v36 = vadd.f32 %v2048_v50, %v735_v35 }
 0x69f   : > { %v1102_v38 = vpop.permute.xlu1 %1101 }
 0x6a0   : > { %813 = vst.msk [vmem:[#allocation5] sm:$0xff] %vm374_vm0, %v812_v36 }
 0x6a7   : > { %v1098_v37 = vld [vmem:[#allocation5] sm:$0xff] }
 0x6a8   : > { %v1104_v39 = vmul.f32 %v1102_v38, %v1098_v37 }
 0x70c   : > { %v1119_v40 = vpop.permute.xlu1 %1118 }
 0x70d   : > { %v1121_v41 = vsel %vm374_vm0, %v1104_v39, %v1119_v40 }
 0x70e   : > { %1123 = vst.msk [vmem:[%s359_s19] sm:$0xff] %vm1122_vm4, %v1121_v41 }
 0x70f   : > { %1621 = shalt.err (!%p1618_p7)
}
 0x710   : > { %s1622_s2 = scalar_lea.hbm %s2066_s13, 128  ;;  %s1626_s17 = scalar_lea.hbm %s2122_s6, 256 }
 0x711   : > { %p1623_p13 = scmp.ne.s32.totalorder %s2066_s13, %s1622_s2  ;;  %p1627_p2 = scmp.lt.u32.totalorder %s2066_s13, %s2122_s6 }
 0x712   : > { %p1628_p12 = scmp.lt.u32.totalorder %s1626_s17, %s1622_s2  ;;  %p1630_p1 = scmp.lt.u32.totalorder %s1622_s2, %s2066_s13 }
 0x713   : > { %p1624_p8 = pnand %p1623_p13, %p2149_p6 }
 0x714   : > { %p1629_p0 = por %p1628_p12, %p1627_p2 }
 0x715   : > { %p1625_p11 = pneg %p1624_p8 }
 0x716   : > { %p1631_p10 = por %p1630_p1, %p1629_p0 }
 0x718   : > { %p1632_p3 = pnand %p1631_p10, %p1625_p11 }
 0x71a   : > { %1635 = shalt.err (!%p1632_p3)
}
 0x71b   : > { %1393 = dma.vmem_to_hbm [thread:$0]  (%p2149_p6), %s2068_s16, 128, %s2066_s13, %s1125_s18  }
 0x71c PF: > { %s1151_s25 = sand.u32 1, %s1682_s21   ;;  %p2150_p4 = scmp.ne.s32.totalorder %s2133_s30, 0 }
 0x71d   : > { %p2151_p9 = scmp.ge.s32.totalorder %s1702_s26, 2  ;;  %s1152_s12 = scalar_lea.sflag [#allocation8], %s1151_s25 }
 0x71f   : > { %p1410_p5 = pnand %p2151_p9, %p2150_p4 }
 0x721   : > { %1677 = dma.done.wait (!%p1410_p5), %s1152_s12, 128  }
 0x722   : > { %1679 = vsyncadd (!%p1410_p5), %s1152_s12, 4294967168  ;;  %s26_s26 = sadd.s32 1, %s1702_s26   ;;  %s2152_s10 = sld [smem:[#allocation22_spill]] }
 0x723   : > { %p23_p7 = scmp.ge.s32.totalorder %s26_s26, 4   ;;  %s2153_s24 = sld [smem:[#allocation20_spill]] }
 0x724   : > { %s2154_s25 = sld [smem:[#allocation21_spill]]  ;;  %s2155_s21 = smov %s1686_s22 }
 0x725   : > { %s2156_s22 = smov %s1690_s23  ;;  %25 = sbr.rel (!%p23_p7) target bundleno = 12 (0xc), region = 127 }
 0x728   : > { %s2157_s23 = smov %s2152_s10 }
 0x72c   :  { %1157 = vsyncpa [#allocation7], 1 }
 0x72d   :  { %1159 = vsyncpa [#allocation7 + $0x1], 1 }
 0x72e   :  { %1160 = vsyncpa [#allocation10], 1 }
 0x72f   :  { %1162 = vsyncpa [#allocation10 + $0x1], 1 }
 0x730   :  { %1163 = vsyncpa [#allocation13], 1 }
 0x731   :  { %1164 = vsyncpa [#allocation8], 1 }
 0x732   :  { %1166 = vsyncpa [#allocation8 + $0x1], 1 }

</bundles_post_ra>
